<compile_context>
chip_gen: v5e
topology: v5e:2x2
jax: 0.10.0
libtpu: 0.0.40
codegen_flags: <defaults>
</compile_context>

<pallas_src>
import jax
import jax.numpy as jnp
from jax.experimental import pallas as pl
from jax.experimental.pallas import tpu as pltpu


def _round_up(x: int, m: int) -> int:
    return ((x + m - 1) // m) * m


def two_layer_kernel(x_ref, w1_ref, w2_ref, o_ref):
    """One [TM, D_in] batch tile: o = relu(x @ W1t) @ W2t.

    Both matmuls hit the MXU with f32 accumulation. ReLU is applied to the f32
    accumulator on the VPU. The hidden activation is deliberately downcast to
    the weight dtype (bf16 on the bf16 path) so the second matmul also gets
    fast MXU inputs.
    """
    h = jnp.dot(x_ref[...], w1_ref[...], preferred_element_type=jnp.float32)
    h = jnp.maximum(h, 0.0)  # clamp(min=0) in f32
    y = jnp.dot(h.astype(w2_ref.dtype), w2_ref[...],
                preferred_element_type=jnp.float32)
    o_ref[...] = y.astype(o_ref.dtype)


def prepare_params(w1, w2):
    """One-time parameter prep (do at load time, NOT inside the forward pass).

    PyTorch nn.Linear stores weight as [out, in]; transpose once to [in, out]
    so the kernel runs plain row-major [M,K]x[K,N] matmuls on the MXU with no
    per-call transpose traffic.
    """
    return w1.T, w2.T  # [D_in, H], [H, D_out]


def two_layer_net(x, w1_t, w2_t, *, block_m: int = 512, compute_dtype=None):
    """Forward pass.

    Args:
      x:     [N, D_in]   float32
      w1_t:  [D_in, H]   pre-transposed linear1 weight (see prepare_params)
      w2_t:  [H, D_out]  pre-transposed linear2 weight
      block_m: batch-tile rows (multiple of 8; start 512-1024, shrink on v7x).
      compute_dtype: optional dtype for MXU inputs (e.g. jnp.bfloat16).
    Returns:
      y: [N, D_out] float32
    """
    N, D_in = x.shape
    assert w1_t.shape[0] == D_in
    H = w1_t.shape[1]
    assert w2_t.shape[0] == H
    D_out = w2_t.shape[1]

    if compute_dtype is not None:
        x = x.astype(compute_dtype)
        w1_t = w1_t.astype(compute_dtype)
        w2_t = w2_t.astype(compute_dtype)

    # ---- batch tiling: TM multiple of 8, pad N up to a multiple of TM --------
    tm = max(8, min(block_m, _round_up(N, 8)))
    tm = _round_up(tm, 8)
    n_pad = _round_up(N, tm)
    if n_pad != N:
        x = jnp.pad(x, ((0, n_pad - N), (0, 0)))  # zero rows -> zero outputs

    # ---- lane-dense output: pad D_out to a multiple of 128 -------------------
    d_out_pad = _round_up(D_out, 128)
    if d_out_pad != D_out:
        w2_t = jnp.pad(w2_t, ((0, 0), (0, d_out_pad - D_out)))  # zero columns

    grid = (n_pad // tm,)

    # ---- cost estimate + VMEM budget -----------------------------------------
    in_itemsize = jnp.dtype(x.dtype).itemsize
    out_bytes = n_pad * d_out_pad * 4
    cost = pl.CostEstimate(
        flops=2 * n_pad * D_in * H + 2 * n_pad * H * d_out_pad,
        transcendentals=0,
        bytes_accessed=(x.size + w1_t.size + w2_t.size) * in_itemsize + out_bytes,
    )
    # double-buffered x/out tiles + resident weights, with ~1.5x headroom
    weight_bytes = (D_in * H + H * d_out_pad) * in_itemsize
    tile_bytes = 2 * tm * D_in * in_itemsize + 2 * tm * d_out_pad * 4
    vmem_limit = int(min(64 << 20,
                         max(32 << 20, int(1.5 * (weight_bytes + tile_bytes)))))

    y_padded = pl.pallas_call(
        two_layer_kernel,
        out_shape=jax.ShapeDtypeStruct((n_pad, d_out_pad), jnp.float32),
        grid_spec=pl.GridSpec(
            grid=grid,
            in_specs=[
                pl.BlockSpec((tm, D_in), lambda i: (i, 0)),        # streamed tile
                pl.BlockSpec((D_in, H), lambda i: (0, 0)),         # resident weight
                pl.BlockSpec((H, d_out_pad), lambda i: (0, 0)),    # resident weight
            ],
            out_specs=pl.BlockSpec((tm, d_out_pad), lambda i: (i, 0)),
        ),
        compiler_params=pltpu.CompilerParams(
            dimension_semantics=("parallel",),   # shard batch tiles on v7x megacore
            vmem_limit_bytes=vmem_limit,
        ),
        cost_estimate=cost,
    )(x, w1_t, w2_t)

    return y_padded[:N, :D_out]


def two_layer_net_ref(x, w1, w2):
    # Pure-JAX reference matching PyTorch semantics (weights in [out, in]).
    h = jnp.maximum(x @ w1.T, 0.0)
    return h @ w2.T


if __name__ == "__main__":
    # Small shapes consistent with the module: x = randn(N, D_in)
    N, D_in, H, D_out = 8, 64, 32, 16

    key = jax.random.PRNGKey(0)
    kx, k1, k2 = jax.random.split(key, 3)
    x = jax.random.normal(kx, (N, D_in), dtype=jnp.float32)
    # Deterministic init, torch.nn.Linear.weight layout = [out, in].
    w1 = jax.random.uniform(k1, (H, D_in), dtype=jnp.float32,
                            minval=-1.0, maxval=1.0) / jnp.sqrt(D_in)
    w2 = jax.random.uniform(k2, (D_out, H), dtype=jnp.float32,
                            minval=-1.0, maxval=1.0) / jnp.sqrt(H)

    # Transpose ONCE at parameter-load time (outside the forward pass).
    w1_t, w2_t = prepare_params(w1, w2)

    y_ref = two_layer_net_ref(x, w1, w2)

    # f32 path: matches the PyTorch reference tightly.
    y = two_layer_net(x, w1_t, w2_t)
    jax.block_until_ready(y)
    assert y.shape == (N, D_out)
    assert jnp.allclose(y, y_ref, atol=1e-4, rtol=1e-4)

    # bf16 MXU-input path (v6e/v7x fast path; f32 accumulate + f32 ReLU).
    y_bf16 = two_layer_net(x, w1_t, w2_t, compute_dtype=jnp.bfloat16)
    jax.block_until_ready(y_bf16)
    assert y_bf16.shape == (N, D_out)
    assert jnp.allclose(y_bf16, y_ref, atol=5e-2, rtol=5e-2)

    print("KERNEL_OK")
</pallas_src>

<mosaic_0001>
module attributes {stable_mosaic.version = 11 : i64} {
  func.func @two_layer_kernel(%arg0: i32, %arg1: memref<8x64xf32, #tpu.memory_space<vmem>>, %arg2: memref<64x32xf32, #tpu.memory_space<vmem>>, %arg3: memref<32x128xf32, #tpu.memory_space<vmem>>, %arg4: memref<8x128xf32, #tpu.memory_space<vmem>>) attributes {dimension_semantics = [#tpu.dimension_semantics<parallel>], iteration_bounds = array<i64: 1>, scalar_prefetch = 0 : i64, scratch_operands = 0 : i64, tpu.core_type = #tpu.core_type<tc>, window_params = [{transform_indices = @transform_0, window_bounds = array<i64: 8, 64>}, {pipeline_mode = #tpu.pipeline_mode<synchronous>, transform_indices = @transform_1, window_bounds = array<i64: 64, 32>}, {pipeline_mode = #tpu.pipeline_mode<synchronous>, transform_indices = @transform_2, window_bounds = array<i64: 32, 128>}, {transform_indices = @transform_3, window_bounds = array<i64: 8, 128>}]} {
    %c0 = arith.constant 0 : index
    %c0_0 = arith.constant 0 : index
    %0 = vector.load %arg1[%c0, %c0_0] : memref<8x64xf32, #tpu.memory_space<vmem>>, vector<8x64xf32>
    %c0_1 = arith.constant 0 : index
    %c0_2 = arith.constant 0 : index
    %1 = vector.load %arg2[%c0_1, %c0_2] : memref<64x32xf32, #tpu.memory_space<vmem>>, vector<64x32xf32>
    %cst = arith.constant dense<0.000000e+00> : vector<8x32xf32>
    %2 = tpu.matmul %0, %1, %cst {dimension_numbers = #tpu.dot_dimension_numbers<[1], [0], [0], [1], [0, 0, 1, 1], [], []>} : vector<8x64xf32>, vector<64x32xf32>, vector<8x32xf32> -> vector<8x32xf32>
    %cst_3 = arith.constant 0.000000e+00 : f32
    %3 = vector.broadcast %cst_3 : f32 to vector<8x32xf32>
    %4 = arith.maximumf %2, %3 : vector<8x32xf32>
    %c0_4 = arith.constant 0 : index
    %c0_5 = arith.constant 0 : index
    %5 = vector.load %arg3[%c0_4, %c0_5] : memref<32x128xf32, #tpu.memory_space<vmem>>, vector<32x128xf32>
    %cst_6 = arith.constant dense<0.000000e+00> : vector<8x128xf32>
    %6 = tpu.matmul %4, %5, %cst_6 {dimension_numbers = #tpu.dot_dimension_numbers<[1], [0], [0], [1], [0, 0, 1, 1], [], []>} : vector<8x32xf32>, vector<32x128xf32>, vector<8x128xf32> -> vector<8x128xf32>
    %c0_7 = arith.constant 0 : index
    %c0_8 = arith.constant 0 : index
    %7 = vector.load %arg4[%c0_7, %c0_8] : memref<8x128xf32, #tpu.memory_space<vmem>>, vector<8x128xf32>
    tpu.vector_store %arg4[%c0_7, %c0_8], %6 {strides = array<i32>} : memref<8x128xf32, #tpu.memory_space<vmem>>, vector<8x128xf32>,
    return
  }
  func.func @transform_0(%arg0: i32) -> (i32, i32) {
    %c0_i32 = arith.constant 0 : i32
    %c0_i32_0 = arith.constant 0 : i32
    return %arg0, %c0_i32 : i32, i32
  }
  func.func @transform_1(%arg0: i32) -> (i32, i32) {
    %c0_i32 = arith.constant 0 : i32
    %c0_i32_0 = arith.constant 0 : i32
    %c0_i32_1 = arith.constant 0 : i32
    return %c0_i32, %c0_i32_0 : i32, i32
  }
  func.func @transform_2(%arg0: i32) -> (i32, i32) {
    %c0_i32 = arith.constant 0 : i32
    %c0_i32_0 = arith.constant 0 : i32
    %c0_i32_1 = arith.constant 0 : i32
    return %c0_i32, %c0_i32_0 : i32, i32
  }
  func.func @transform_3(%arg0: i32) -> (i32, i32) {
    %c0_i32 = arith.constant 0 : i32
    %c0_i32_0 = arith.constant 0 : i32
    return %arg0, %c0_i32 : i32, i32
  }
}

</mosaic_0001>

<bundles_post_ra>
// kernel: tpu_custom_call.1
= control target key start
LH: loop header
LB: loop body
LE: loop exit
PB: predicated region body
PF: predicated region fallthrough
CT: control target
= control target key end

     0   :  { %s186_s0 = inlined_call_operand.vmem [shape: f32[8,64], index: 0, kind: input, shape index: {}]   ;;  %s187_s1 = inlined_call_operand.vmem [shape: f32[64,32], index: 1, kind: input, shape index: {}]   ;;  %s188_s2 = inlined_call_operand.vmem [shape: f32[32,128], index: 2, kind: input, shape index: {}]   ;;  %s189_s3 = inlined_call_operand.hbm [shape: f32[8,128], index: 3, kind: output, shape index: {}]  }
   0x1   :  { %v23_v0 = vld [vmem:[%s187_s1 + $0x38] sm:$0xff]  ;;  %v22_v1 = vld [vmem:[%s187_s1 + $0x30] sm:$0xff]  ;;  %v21_v2 = vld [vmem:[%s187_s1 + $0x28] sm:$0xff] }
   0x2   :  { %36 = vmatpush.msra.mxu0 %v23_v0  ;;  %v52_v3 = vld [vmem:[%s188_s2 + $0x18] sm:$0xff]  ;;  %v51_v4 = vld [vmem:[%s188_s2 + $0x10] sm:$0xff] }
   0x4   :  { %37 = vmatpush.msra.mxu0 %v22_v1 }
   0x5   :  { %8 = vsyncpa [#allocation3], 0  ;;  %v20_v5 = vld [vmem:[%s187_s1 + $0x20] sm:$0xff]  ;;  %69 = vmatpush.msra.mxu1 %v52_v3  ;;  %v19_v6 = vld [vmem:[%s187_s1 + $0x18] sm:$0xff]  ;;  %vm24_vm0 = vcmask 523264   ;;  %vm53_vm1 = vcmask 261120  }
   0x6   :  { %38 = vmatpush.msra.mxu0 %v21_v2  ;;  %v18_v7 = vld [vmem:[%s187_s1 + $0x10] sm:$0xff]  ;;  %v17_v8 = vld [vmem:[%s187_s1 + $0x8] sm:$0xff]  ;;  %v16_v9 = vld [vmem:[%s187_s1] sm:$0xff]  ;;  %s123_s1 = smov [#allocation2]   ;;  %s85_s13 = sshll.u32 %s189_s3, 4  ;;  %s86_s13 = int_to_ptr.hbm [resolvable:$true] %s85_s13 }
   0x7   :  { %70 = vmatpush.msra.mxu1 %v51_v4  ;;  %v15_v10 = vld [vmem:[%s186_s0] sm:$0xff]  ;;  %v50_v11 = vld [vmem:[%s188_s2 + $0x8] sm:$0xff]  ;;  %s83_s11 = sshll.u32 %s123_s1, 4  ;;  %s84_s11 = int_to_ptr.vmem [resolvable:$true] %s83_s11 }
   0x8   :  { %39 = vmatpush.msra.mxu0 %v20_v5  ;;  %v49_v12 = vld [vmem:[%s188_s2] sm:$0xff] }
   0x9   :  { %71 = vmatpush.msra.mxu1 %v50_v11 }
   0xa   :  { %40 = vmatpush.msra.mxu0 %v19_v6 }
   0xb   :  { %72 = vmatpush.msra.mxu1 %v49_v12 }
   0xc   :  { %41 = vmatpush.msra.mxu0 %v18_v7 }
   0xe   :  { %42 = vmatpush.msra.mxu0 %v17_v8 }
  0x10   :  { %43 = vmatpush.msra.mxu0 %v16_v9 }
  0x11   :  { %94 = vmatmul.msk.f32.vlgmr.msra.gmra.mxu0 %vm24_vm0, %v15_v10 }
  0x8e   :  { %v45_v13 = vpop.f32.mrf.mxu0 }
  0x8f   :  { %v48_v14 = vmax.f32 %v45_v13, 0.0 }
  0x91   :  { %95 = vmatmul.msk.f32.vlgmr.msra.gmra.mxu1 %vm53_vm1, %v48_v14 }
 0x10e   :  { %v74_v15 = vpop.f32.mrf.mxu1 }
 0x10f   :  { %77 = vst [vmem:[#allocation2] sm:$0xff] %v74_v15 }
 0x110   :  { %88 = dma.vmem_to_hbm [thread:$0]  %s84_s11, 128, %s86_s13, [#allocation3]  }
 0x111   :  { %121 = dma.done.wait [#allocation3], 128  }
 0x112   :  { %122 = vsyncadd [#allocation3], 4294967168 }
 0x113   :  { %93 = vsyncpa [#allocation3], 1 }

</bundles_post_ra>
